<compile_context>
chip_gen: v6e
topology: v6e:2x2x1
jax: 0.10.0
libtpu: 0.0.40
codegen_flags: <defaults>
</compile_context>

<pallas_src>
import math

import jax
import jax.numpy as jnp
from jax.experimental import pallas as pl
from jax.experimental.pallas import tpu as pltpu

EPS = 1e-5

# Below this many input bytes, the fixed pallas_call launch / DMA-setup
# overhead (~us) dominates; plain fused XLA elementwise is as fast or faster.
_FAST_PATH_BYTES = 96 * 1024


def _norm1d_kernel(x_ref, p_ref, o_ref):
    # p_ref is (2, F): row 0 = scale, row 1 = shift.  Its constant index_map
    # keeps it VMEM-resident; only the x / o batch tiles stream per grid step.
    scale = p_ref[0:1, :]                      # (1, F) -> broadcasts over rows
    shift = p_ref[1:2, :]
    o_ref[...] = x_ref[...] * scale + shift    # one VPU fused multiply-add


def _block_budget_bytes():
    """Per-block byte budget derived from the chip's VMEM capacity.

    Targets the >=1 MiB knee of the HBM-bandwidth curve while keeping the
    double-buffered footprint (~2x input + 2x output blocks ~= 4x block bytes)
    inside every generation's scoped VMEM (v7x has only 64 MiB physical).
    """
    try:
        cap = pltpu.get_tpu_info().vmem_capacity_bytes
    except Exception:
        cap = 64 << 20          # conservative (v7x-sized) fallback
    # 128 MiB chips (v5e/v6e) -> 4 MiB blocks; 64 MiB (v7x) -> 2 MiB blocks.
    return max(1 << 20, min(4 << 20, cap // 32))


def _choose_tile_b(B, F):
    row_bytes = F * 4
    tile = _block_budget_bytes() // row_bytes
    # Keep >= ~4 grid steps so v7x megacore ("parallel") has work for both
    # TensorCores and DMA/compute stay double-buffered.
    tile = min(tile, -(-B // 4))
    tile = max(8, (tile // 8) * 8)             # sublane (8) alignment
    return tile


def _norm1d_pallas(x, params):
    B, F = x.shape
    tile_b = _choose_tile_b(B, F)
    grid = (-(-B // tile_b),)   # cdiv grid: padded last block is safe (elementwise)

    return pl.pallas_call(
        _norm1d_kernel,
        out_shape=jax.ShapeDtypeStruct((B, F), jnp.float32),
        grid_spec=pltpu.PrefetchScalarGridSpec(
            num_scalar_prefetch=0,
            grid=grid,
            in_specs=[
                pl.BlockSpec((tile_b, F), lambda i: (i, 0)),   # streamed x tile
                pl.BlockSpec((2, F), lambda i: (0, 0)),        # VMEM-resident params
            ],
            out_specs=pl.BlockSpec((tile_b, F), lambda i: (i, 0)),
        ),
        compiler_params=pltpu.CompilerParams(
            dimension_semantics=("parallel",),       # 2-TC split on v7x
            vmem_limit_bytes=32 * 1024 * 1024,       # v5e default (16 MiB) is tight
        ),
    )(x, params)


def norm1d_forward(x, gamma, beta, m, v, eps=EPS):
    """Pallas TPU forward of NormFunction1D: (x - m)/sqrt(v+eps)*gamma + beta."""
    x = jnp.asarray(x, jnp.float32)
    B, F = x.shape

    # Accept (F,) or (1, F) parameters.
    gamma = jnp.asarray(gamma, jnp.float32).reshape(1, -1)
    beta = jnp.asarray(beta, jnp.float32).reshape(1, -1)
    m = jnp.asarray(m, jnp.float32).reshape(1, -1)
    v = jnp.asarray(v, jnp.float32).reshape(1, -1)

    # Fold the fixed-statistic norm into a single scale/shift (tiny XLA ops).
    scale = gamma * jax.lax.rsqrt(v + eps)     # (1, F)
    shift = beta - m * scale                   # (1, F)

    # Tiny inputs: kernel launch overhead dominates -> let XLA fuse it.
    if B * F * 4 <= _FAST_PATH_BYTES:
        return x * scale + shift

    params = jnp.concatenate([scale, shift], axis=0)   # (2, F) -> one small DMA

    # Lane-dense repack when F is not a multiple of 128: fold k rows into one
    # so the output last dim becomes a multiple of 128 (dense vst, full lanes).
    if F % 128 != 0:
        k = 128 // math.gcd(F, 128)
        if B % k == 0:
            x2 = x.reshape(B // k, k * F)              # contiguous reshape: free
            params2 = jnp.tile(params, (1, k))         # (2, k*F)
            out = _norm1d_pallas(x2, params2)
            return out.reshape(B, F)
        # else: fall through to the masked-store path for awkward B.

    return _norm1d_pallas(x, params)


def reference_forward(x, gamma, beta, m, v, eps=EPS):
    """Pure-JAX replica of the PyTorch forward (unfolded 1/sqrt form)."""
    return (x - m) / jnp.sqrt(v + eps) * gamma + beta


if __name__ == "__main__":
    key = jax.random.PRNGKey(0)

    # (8, 28)    : module-typical tiny case       -> XLA fast path
    # (1024, 28) : lane-dense repack (k=32 -> 896) -> dense-store kernel path
    # (1000, 28) : B % 32 != 0 fallback            -> masked stores + cdiv grid
    # (512, 128) : already lane-dense              -> 4-step parallel grid
    for (batch, features) in ((8, 28), (1024, 28), (1000, 28), (512, 128)):
        key, kx, kg, kb, km, kv = jax.random.split(key, 6)
        x = jax.random.normal(kx, (batch, features), jnp.float32)
        gamma = 1.0 + 0.1 * jax.random.normal(kg, (1, features), jnp.float32)
        beta = 0.1 * jax.random.normal(kb, (1, features), jnp.float32)
        m = jax.random.normal(km, (1, features), jnp.float32)
        v = jax.random.uniform(kv, (1, features), jnp.float32, 0.5, 1.5)

        out = jax.block_until_ready(norm1d_forward(x, gamma, beta, m, v))
        ref = reference_forward(x, gamma, beta, m, v)
        assert out.shape == (batch, features)
        err = float(jnp.max(jnp.abs(out - ref)))
        assert jnp.allclose(out, ref, atol=1e-5, rtol=1e-5), err

    print("KERNEL_OK")
</pallas_src>

<mosaic_0001>
module attributes {stable_mosaic.version = 11 : i64} {
  func.func @_norm1d_kernel(%arg0: i32, %arg1: memref<8x896xf32, #tpu.memory_space<vmem>>, %arg2: memref<2x896xf32, #tpu.memory_space<vmem>>, %arg3: memref<8x896xf32, #tpu.memory_space<vmem>>) attributes {dimension_semantics = [#tpu.dimension_semantics<parallel>], iteration_bounds = array<i64: 4>, scalar_prefetch = 0 : i64, scratch_operands = 0 : i64, tpu.core_type = #tpu.core_type<tc>, window_params = [{transform_indices = @transform_0, window_bounds = array<i64: 8, 896>}, {pipeline_mode = #tpu.pipeline_mode<synchronous>, transform_indices = @transform_1, window_bounds = array<i64: 2, 896>}, {transform_indices = @transform_2, window_bounds = array<i64: 8, 896>}]} {
    %c0 = arith.constant 0 : index
    %c0_0 = arith.constant 0 : index
    %0 = vector.load %arg2[%c0, %c0_0] : memref<2x896xf32, #tpu.memory_space<vmem>>, vector<1x896xf32>
    %c1 = arith.constant 1 : index
    %c0_1 = arith.constant 0 : index
    %1 = vector.load %arg2[%c1, %c0_1] : memref<2x896xf32, #tpu.memory_space<vmem>>, vector<1x896xf32>
    %c0_2 = arith.constant 0 : index
    %c0_3 = arith.constant 0 : index
    %2 = vector.load %arg1[%c0_2, %c0_3] : memref<8x896xf32, #tpu.memory_space<vmem>>, vector<8x896xf32>
    %3 = vector.broadcast %0 : vector<1x896xf32> to vector<8x896xf32>
    %4 = arith.mulf %2, %3 : vector<8x896xf32>
    %5 = vector.broadcast %1 : vector<1x896xf32> to vector<8x896xf32>
    %6 = arith.addf %4, %5 : vector<8x896xf32>
    %c0_4 = arith.constant 0 : index
    %c0_5 = arith.constant 0 : index
    %7 = vector.load %arg3[%c0_4, %c0_5] : memref<8x896xf32, #tpu.memory_space<vmem>>, vector<8x896xf32>
    tpu.vector_store %arg3[%c0_4, %c0_5], %6 {strides = array<i32>} : memref<8x896xf32, #tpu.memory_space<vmem>>, vector<8x896xf32>,
    return
  }
  func.func @transform_0(%arg0: i32) -> (i32, i32) {
    %c0_i32 = arith.constant 0 : i32
    %c0_i32_0 = arith.constant 0 : i32
    return %arg0, %c0_i32 : i32, i32
  }
  func.func @transform_1(%arg0: i32) -> (i32, i32) {
    %c0_i32 = arith.constant 0 : i32
    %c0_i32_0 = arith.constant 0 : i32
    %c0_i32_1 = arith.constant 0 : i32
    return %c0_i32, %c0_i32_0 : i32, i32
  }
  func.func @transform_2(%arg0: i32) -> (i32, i32) {
    %c0_i32 = arith.constant 0 : i32
    %c0_i32_0 = arith.constant 0 : i32
    return %arg0, %c0_i32 : i32, i32
  }
}

</mosaic_0001>

<bundles_post_ra>
// kernel: tpu_custom_call.1
= control target key start
LH: loop header
LB: loop body
LE: loop exit
PB: predicated region body
PF: predicated region fallthrough
CT: control target
= control target key end

     0   :  { %7 = vsyncpa [#allocation3], 0  ;;  %s767_s0 = inlined_call_operand.hbm [shape: f32[32,896], index: 0, kind: input, shape index: {}]   ;;  %s768_s1 = inlined_call_operand.hbm [shape: f32[2,896], index: 1, kind: input, shape index: {}]   ;;  %s769_s2 = inlined_call_operand.hbm [shape: f32[32,896], index: 2, kind: output, shape index: {}]  }
   0x1   :  { %9 = vsyncpa [#allocation3 + $0x1], 0 }
   0x2   :  { %10 = vsyncpa [#allocation6], 0 }
   0x3   :  { %11 = vsyncpa [#allocation4], 0 }
   0x4   :  { %13 = vsyncpa [#allocation4 + $0x1], 0  ;;  %s584_s9 = smov 0   ;;  %s586_s10 = smov 0  }
   0x5   :  { %s588_s11 = smov 0   ;;  %s590_s12 = smov 0  }
   0x6 LB: > { %s605_s13 = sadd.s32 4294967295, %s564_s12   ;;  %s371_s14 = sadd.s32 4294967294, %s564_s12   ;;  %s564_s12 = sphi %s590_s12, %s791_s12   ;;  %s560_s11 = sphi %s588_s11, %s790_s11   ;;  %s556_s10 = sphi %s586_s10, %s789_s10   ;;  %s552_s9 = sphi %s584_s9, %s788_s9  }
   0x7   : > { %p39_p0 = scmp.ne.s32.totalorder %s556_s10, %s552_s9  ;;  %p770_p1 = scmp.eq.s32.totalorder %s605_s13, 0 }
   0x8   : > { %p90_p3 = scmp.eq.s32.totalorder %s371_s14, 3  ;;  %p372_p5 = scmp.ge.s32.totalorder %s564_s12, 1 }
   0x9   : > { %p614_p4 = por %p770_p1, %p39_p0  ;;  %p97_p7 = scmp.lt.s32.totalorder %s564_s12, 5 }
   0xa   : > { %p619_p6 = por %p90_p3, %p39_p0  ;;  %s566_s18 = smov [#allocation5]  }
   0xb   : > { %s774_s15 = scalar_select %p614_p4, 1, 0 }
   0xc   : > { %s775_s16 = scalar_select %p619_p6, 1, 0 }
   0xd   : > { %p624_p8 = pnand %p372_p5, %p97_p7  ;;  %s110_s19 = sshll.u32 %s566_s18, 4  ;;  %s111_s19 = int_to_ptr.vmem [resolvable:$true] %s110_s19 }
   0xe   : > { %s631_s20 = sadd.s32 1, %s564_s12   ;;  %s26_s24 = sadd.s32 1, %s560_s11 }
   0xf   : > { %s776_s17 = scalar_select %p624_p8, 1, 0 }
  0x10   : > { %p393_p9 = pneg %p624_p8  ;;  %s23_s22 = ssub.s32 %s564_s12, %s631_s20 }
  0x11   : > { %p641_p11 = scmp.eq.s32.totalorder %s23_s22, 0  ;;  %p33_p12 = scmp.ne.s32.totalorder %s560_s11, %s556_s10 }
  0x12   : > { %p635_p10 = pnand %p393_p9, %p770_p1  ;;  %s453_s25 = scalar_lea.vmem %s111_s19, 224 }
  0x13   : > { %p454_p0 = scmp.ne.s32.totalorder %s111_s19, %s453_s25  ;;  %p461_p7 = scmp.lt.s32.totalorder %s111_s19, %s111_s19 }
  0x14   : > { %p444_p13 = pneg %p635_p10  ;;  %p462_p2 = scmp.lt.s32.totalorder %s453_s25, %s453_s25 }
  0x16   : > { %p456_p3 = pnand %p454_p0, %p444_p13  ;;  %p463_p9 = por %p462_p2, %p461_p7 }
  0x18   : > { %p457_p5 = pneg %p456_p3 }
  0x1a   : > { %p464_p1 = pnand %p463_p9, %p457_p5 }
  0x1c   : > { %467 = shalt.err (!%p464_p1)
}
  0x1d   : > { %396 = dma.hbm_to_vmem [thread:$0]  (!%p635_p10), %s768_s1, 224, %s111_s19, [#allocation6]  }
  0x1e   : > { %s658_s28 = scalar_select %p641_p11, %s560_s11, %s26_s24  }
  0x1f   : > { %p34_p1 = scmp.eq.s32.totalorder %s564_s12, 0  ;;  %p779_p2 = scmp.eq.s32.totalorder %s605_s13, 3 }
  0x20   : > { %p406_p0 = scmp.lt.s32.totalorder %s564_s12, 4  ;;  %s121_s30 = sand.u32 1, %s560_s11  }
  0x21   : > { %p666_p13 = por %p779_p2, %p33_p12  ;;  %p35_p3 = por %p34_p1, %p33_p12 }
  0x22   : > { %s381_s3 = smul.u32 56, %s121_s30  ;;  %s122_s19 = scalar_lea.sflag [#allocation3], %s121_s30 }
  0x23   : > { %s780_s29 = scalar_select %p666_p13, 1, 0 }
  0x24   : > { %s382_s4 = smul.u32 896, %s564_s12  ;;  %p676_p5 = pnand %p406_p0, %p35_p3 }
  0x25   : > { %s125_s14 = scalar_lea.vmem [#allocation2], %s381_s3  ;;  %s473_s24 = scalar_lea.hbm %s767_s0, 3584 }
  0x26   : > { %s683_s8 = scalar_lea.hbm %s767_s0, %s382_s4  ;;  %s133_s18 = sshll.u32 %s125_s14, 4  ;;  %s134_s18 = int_to_ptr.vmem [resolvable:$true] %s133_s18 }
  0x27   : > { %s468_s21 = scalar_lea.hbm %s683_s8, 896  ;;  %p470_p11 = pneg %p676_p5 }
  0x28   : > { %p469_p10 = scmp.ne.s32.totalorder %s683_s8, %s468_s21  ;;  %p474_p9 = scmp.lt.s32.totalorder %s683_s8, %s767_s0 }
  0x29   : > { %p475_p1 = scmp.lt.s32.totalorder %s473_s24, %s468_s21 }
  0x2a   : > { %p471_p12 = pnand %p470_p11, %p469_p10 }
  0x2b   : > { %p476_p2 = por %p475_p1, %p474_p9 }
  0x2c   : > { %p472_p7 = pneg %p471_p12 }
  0x2e   : > { %p477_p0 = pnand %p476_p2, %p472_p7 }
  0x30   : > { %480 = shalt.err (!%p477_p0)
}
  0x31   : > { %s481_s27 = scalar_lea.vmem %s134_s18, 896  ;;  %s567_s30 = smov [#allocation2]  }
  0x32   : > { %p482_p3 = scmp.ne.s32.totalorder %s134_s18, %s481_s27  ;;  %s486_s3 = sshll.u32 %s567_s30, 4  ;;  %s487_s3 = int_to_ptr.vmem [resolvable:$false] %s486_s3 }
  0x33   : > { %s488_s4 = scalar_lea.vmem %s487_s3, 1792  ;;  %p489_p10 = scmp.lt.s32.totalorder %s134_s18, %s487_s3 }
  0x34   : > { %p484_p6 = pnand %p482_p3, %p470_p11  ;;  %p490_p12 = scmp.lt.s32.totalorder %s488_s4, %s481_s27 }
  0x36   : > { %p485_p13 = pneg %p484_p6  ;;  %p491_p4 = por %p490_p12, %p489_p10 }
  0x38   : > { %p492_p8 = pnand %p491_p4, %p485_p13 }
  0x3a   : > { %495 = shalt.err (!%p492_p8)
}
  0x3b   : > { %400 = dma.hbm_to_vmem [thread:$0]  (!%p676_p5), %s683_s8, 896, %s134_s18, %s122_s19  }
  0x3c   : > { %p782_p7 = scmp.ne.s32.totalorder %s776_s17, 0 }
  0x3d   : > { %s702_s6 = sand.u32 (!%p782_p7), 1, %s556_s10   ;;  %p783_p4 = scmp.ne.s32.totalorder (!%p782_p7), %s774_s15, 0 }
  0x3e   : > { %142 = sbr.rel (%p782_p7) target bundleno = 100 (0x64), region = 28  ;;  %s145_s14 = scalar_lea.sflag (!%p782_p7), [#allocation3], %s702_s6 }
  0x3f   : > { %s383_s7 = smul.u32 (!%p782_p7), 56, %s702_s6 }
  0x41   : > { %s708_s21 = scalar_lea.vmem (!%p782_p7), [#allocation2], %s383_s7 }
  0x43   : > { %539 = dma.done.wait (%p783_p4), %s145_s14, 896  }
  0x44   : > { %541 = vsyncadd (%p783_p4), %s145_s14, 4294966400  ;;  %p784_p6 = scmp.eq.s32.totalorder %s605_s13, 0 }
  0x46   : > { %543 = dma.done.wait (%p784_p6), [#allocation6], 224   ;;  %p785_p8 = pmov %p784_p6 }
  0x47   : > { %v184_v0 = vlaneseq  ;;  %v173_v8 = vld [vmem:[#allocation5] ss:$2 sm:$0xff]  ;;  %v175_v9 = vld [vmem:[#allocation5 + $0x1] ss:$2 sm:$0xff]  ;;  %v177_v14 = vld [vmem:[%s708_s21 + $0x8] sm:$0xff]  ;;  %s384_s15 = smul.u32 896, %s605_s13 }
  0x48   : > { %545 = vsyncadd (%p785_p8), [#allocation6], 4294967072  ;;  %v176_v10 = vld [vmem:[%s708_s21] sm:$0xff]  ;;  %v178_v17 = vld [vmem:[%s708_s21 + $0x10] sm:$0xff]  ;;  %s172_s17 = scalar_lea.vmem [#allocation7], %s383_s7  ;;  %s277_s19 = scalar_lea.sflag [#allocation4], %s702_s6 }
  0x49   : > { %v185_v1 = vshrl.u32 %v184_v0, 7  ;;  %v179_v18 = vld [vmem:[%s708_s21 + $0x18] sm:$0xff]  ;;  %v180_v23 = vld [vmem:[%s708_s21 + $0x20] sm:$0xff]  ;;  %v181_v28 = vld [vmem:[%s708_s21 + $0x28] sm:$0xff]  ;;  %s291_s5 = sshll.u32 %s172_s17, 4  ;;  %s731_s18 = scalar_lea.hbm %s769_s2, %s384_s15  ;;  %s292_s5 = int_to_ptr.vmem [resolvable:$true] %s291_s5 }
  0x4a   : > { %v182_v33 = vld [vmem:[%s708_s21 + $0x30] sm:$0xff]  ;;  %s496_s22 = scalar_lea.vmem %s292_s5, 896  ;;  %p786_p5 = scmp.ne.s32.totalorder %s780_s29, 0 }
  0x4b   : > { %v186_v2 = vsub.s32 0, %v185_v1  ;;  %v190_v3 = vsub.s32 1, %v185_v1  ;;  %v194_v4 = vsub.s32 2, %v185_v1  ;;  %v198_v5 = vsub.s32 3, %v185_v1  ;;  %p497_p13 = scmp.ne.s32.totalorder %s292_s5, %s496_s22  ;;  %s568_s23 = smov [#allocation7]  }
  0x4c   : > { %v202_v6 = vsub.s32 4, %v185_v1  ;;  %v206_v7 = vsub.s32 5, %v185_v1  ;;  %v210_v11 = vsub.s32 6, %v185_v1  ;;  %s500_s24 = sshll.u32 %s568_s23, 4  ;;  %s501_s24 = int_to_ptr.vmem [resolvable:$false] %s500_s24 }
  0x4d   : > { %v187_v12 = vrot.slane %v173_v8, %v186_v2  ;;  %v230_v13 = vrot.slane %v175_v9, %v186_v2  ;;  %v191_v15 = vrot.slane %v173_v8, %v190_v3  ;;  %v234_v16 = vrot.slane %v175_v9, %v190_v3  ;;  %p498_p11 = pnand %p497_p13, %p786_p5  ;;  %s502_s25 = scalar_lea.vmem %s501_s24, 1792 }
  0x4e   : > { %v195_v19 = vrot.slane %v173_v8, %v194_v4  ;;  %v238_v20 = vrot.slane %v175_v9, %v194_v4  ;;  %v199_v21 = vrot.slane %v173_v8, %v198_v5  ;;  %v242_v22 = vrot.slane %v175_v9, %v198_v5  ;;  %p503_p1 = scmp.lt.s32.totalorder %s292_s5, %s501_s24  ;;  %p504_p2 = scmp.lt.s32.totalorder %s502_s25, %s496_s22 }
  0x4f   : > { %v219_v24 = vmul.f32 %v187_v12, %v176_v10  ;;  %v220_v25 = vmul.f32 %v191_v15, %v177_v14  ;;  %v203_v26 = vrot.slane %v173_v8, %v202_v6  ;;  %v246_v27 = vrot.slane %v175_v9, %v202_v6  ;;  %p499_p9 = pneg %p498_p11 }
  0x50   : > { %v221_v29 = vmul.f32 %v195_v19, %v178_v17  ;;  %v222_v30 = vmul.f32 %v199_v21, %v179_v18  ;;  %v207_v31 = vrot.slane %v173_v8, %v206_v7  ;;  %v250_v32 = vrot.slane %v175_v9, %v206_v7  ;;  %p505_p0 = por %p504_p2, %p503_p1 }
  0x51   : > { %v262_v34 = vadd.f32 %v230_v13, %v219_v24  ;;  %v263_v35 = vadd.f32 %v234_v16, %v220_v25  ;;  %v223_v36 = vmul.f32 %v203_v26, %v180_v23  ;;  %v211_v37 = vrot.slane %v173_v8, %v210_v11 }
  0x52   : > { %v264_v38 = vadd.f32 %v238_v20, %v221_v29  ;;  %v265_v39 = vadd.f32 %v242_v22, %v222_v30  ;;  %v224_v40 = vmul.f32 %v207_v31, %v181_v28  ;;  %v254_v41 = vrot.slane %v175_v9, %v210_v11  ;;  %p506_p3 = pnand %p505_p0, %p499_p9 }
  0x53   : > { %269 = vst [vmem:[%s172_s17] sm:$0xff] %v262_v34  ;;  %270 = vst [vmem:[%s172_s17 + $0x8] sm:$0xff] %v263_v35  ;;  %v266_v42 = vadd.f32 %v246_v27, %v223_v36  ;;  %v225_v43 = vmul.f32 %v211_v37, %v182_v33 }
  0x54   : > { %271 = vst [vmem:[%s172_s17 + $0x10] sm:$0xff] %v264_v38  ;;  %272 = vst [vmem:[%s172_s17 + $0x18] sm:$0xff] %v265_v39  ;;  %v267_v44 = vadd.f32 %v250_v32, %v224_v40 }
  0x55   : > { %273 = vst [vmem:[%s172_s17 + $0x20] sm:$0xff] %v266_v42  ;;  %v268_v45 = vadd.f32 %v254_v41, %v225_v43 }
  0x56   : > { %274 = vst [vmem:[%s172_s17 + $0x28] sm:$0xff] %v267_v44 }
  0x57   : > { %275 = vst [vmem:[%s172_s17 + $0x30] sm:$0xff] %v268_v45 }
  0x58   : > { %509 = shalt.err (!%p506_p3)
}
  0x59   : > { %s510_s26 = scalar_lea.hbm %s731_s18, 896  ;;  %s514_s3 = scalar_lea.hbm %s769_s2, 3584 }
  0x5a   : > { %p511_p10 = scmp.ne.s32.totalorder %s731_s18, %s510_s26  ;;  %p515_p4 = scmp.lt.s32.totalorder %s731_s18, %s769_s2 }
  0x5b   : > { %p516_p6 = scmp.lt.s32.totalorder %s514_s3, %s510_s26 }
  0x5c   : > { %p512_p12 = pnand %p511_p10, %p786_p5 }
  0x5d   : > { %p517_p8 = por %p516_p6, %p515_p4 }
  0x5e   : > { %p513_p7 = pneg %p512_p12 }
  0x60   : > { %p518_p13 = pnand %p517_p8, %p513_p7 }
  0x62   : > { %521 = shalt.err (!%p518_p13)
}
  0x63   : > { %391 = dma.vmem_to_hbm [thread:$0]  (%p786_p5), %s292_s5, 896, %s731_s18, %s277_s19  }
  0x64 PF: > { %p408_p11 = scmp.ge.s32.totalorder %s564_s12, 2  ;;  %s303_s7 = sand.u32 1, %s552_s9  }
  0x65   : > { %p787_p9 = scmp.ne.s32.totalorder %s775_s16, 0  ;;  %s304_s14 = scalar_lea.sflag [#allocation4], %s303_s7 }
  0x67   : > { %p402_p1 = pnand %p408_p11, %p787_p9 }
  0x69   : > { %p403_p2 = pneg %p402_p1 }
  0x6b   : > { %547 = dma.done.wait (%p403_p2), %s304_s14, 896  }
  0x6c   : > { %549 = vsyncadd (%p403_p2), %s304_s14, 4294966400  ;;  %p16_p0 = scmp.ge.s32.totalorder %s631_s20, 6   ;;  %s788_s9 = smov %s556_s10 }
  0x6d   : > { %s789_s10 = smov %s560_s11  ;;  %s790_s11 = smov %s658_s28 }
  0x6e   : > { %s791_s12 = smov %s631_s20  ;;  %18 = sbr.rel (!%p16_p0) target bundleno = 6 (0x6), region = 78 }
  0x73   :  { %309 = vsyncpa [#allocation3], 1 }
  0x74   :  { %311 = vsyncpa [#allocation3 + $0x1], 1 }
  0x75   :  { %312 = vsyncpa [#allocation6], 1 }
  0x76   :  { %313 = vsyncpa [#allocation4], 1 }
  0x77   :  { %315 = vsyncpa [#allocation4 + $0x1], 1 }

</bundles_post_ra>
